<compile_context>
chip_gen: v6e
topology: v6e:2x2x1
jax: 0.10.0
libtpu: 0.0.40
codegen_flags: <defaults>
</compile_context>

<pallas_src>
import functools

import jax
import jax.numpy as jnp
from jax import lax
from jax.experimental import pallas as pl
from jax.experimental.pallas import tpu as pltpu


def _tpu_budgets():
    """Generation-aware (vmem_limit_bytes, per-step tile I/O budget)."""
    capacity = 64 * 1024 * 1024  # conservative fallback: v7x per-TC VMEM
    try:
        capacity = int(pltpu.get_tpu_info().vmem_capacity_bytes)
    except Exception:
        pass
    vmem_limit = (capacity * 3) // 4   # ~48 MiB on v7x, ~96 MiB on v5e/v6e
    io_budget = capacity // 3          # ~21 MiB on v7x, ~42 MiB on v5e/v6e
    return vmem_limit, io_budget


def _is_two_tensorcore_chip():
    """True on chips with 2 TensorCores sharing the grid (v7x)."""
    try:
        kind = jax.devices()[0].device_kind.lower()
        return ("v7" in kind) or ("7x" in kind)
    except Exception:
        return False


def _ln_kernel(x_ref, alpha_ref, beta_ref, o_ref, *, epsilon, inv_d):
    x = x_ref[...]
    if x.dtype != jnp.float32:
        x = x.astype(jnp.float32)          # f32 accumulation (mandatory for bf16 on v5e)

    # XLU reductions, scaled by a compile-time reciprocal (single vmul,
    # no divide on the critical path).  Two-pass centered variance for
    # numerical stability.
    mean = jnp.sum(x, axis=-1, keepdims=True) * inv_d
    xc = x - mean
    var = jnp.sum(xc * xc, axis=-1, keepdims=True) * inv_d
    inv_std = lax.rsqrt(var + epsilon)     # EUP rsqrt

    alpha = alpha_ref[...]
    beta = beta_ref[...]
    if alpha.dtype != jnp.float32:
        alpha = alpha.astype(jnp.float32)
    if beta.dtype != jnp.float32:
        beta = beta.astype(jnp.float32)

    # (1, D) alpha/beta broadcast implicitly against the (tm, D) tile.
    o_ref[...] = (xc * inv_std * alpha + beta).astype(o_ref.dtype)


def _choose_tm(n, d, dtype, io_budget, two_tc):
    """Largest sublane-aligned row tile fitting the per-step VMEM I/O budget."""
    itemsize = jnp.dtype(dtype).itemsize
    # Sublane packing: 8 rows/vreg for 32-bit, 16 for 16-bit, 32 for 8-bit.
    sub = 8 * (4 // itemsize) if itemsize < 4 else 8
    # Per-row VMEM: 2 pipeline buffers x (input + output tile) + ~2 live f32
    # temporaries in the body (centered x, and the output before the cast).
    per_row = 4 * d * itemsize + 2 * d * 4
    tm = max(sub, (io_budget // per_row) // sub * sub)

    n_ceil = -(-n // sub) * sub
    if two_tc and n_ceil >= 4 * sub:
        # v7x megacore: keep >= 4 grid steps (2 per TensorCore) so each core
        # still double-buffers its DMA.  Single-TC chips keep the full tile.
        tm = min(tm, max(sub, (n_ceil // 4) // sub * sub))
    return min(tm, n_ceil)


def ln_v4(x, alpha, beta, epsilon=1e-5, tm=None):
    """x: [N, D]; alpha, beta: [1, D]. LayerNorm over the last axis."""
    n, d = x.shape
    vmem_limit, io_budget = _tpu_budgets()
    two_tc = _is_two_tensorcore_chip()
    if tm is None:
        tm = _choose_tm(n, d, x.dtype, io_budget, two_tc)

    # Ragged N handled directly by the cdiv grid: OOB reads of the partial
    # last block are garbage (independent rows), OOB writes are masked.
    grid = (pl.cdiv(n, tm),)

    itemsize = jnp.dtype(x.dtype).itemsize
    cost = pl.CostEstimate(
        flops=int(7 * n * d),
        transcendentals=int(n),
        bytes_accessed=int(2 * n * d * itemsize
                           + (alpha.size + beta.size) * jnp.dtype(alpha.dtype).itemsize),
    )

    kernel = functools.partial(_ln_kernel, epsilon=float(epsilon), inv_d=1.0 / d)

    return pl.pallas_call(
        kernel,
        out_shape=jax.ShapeDtypeStruct((n, d), x.dtype),
        grid_spec=pltpu.PrefetchScalarGridSpec(
            num_scalar_prefetch=0,
            grid=grid,
            in_specs=[
                pl.BlockSpec((tm, d), lambda i: (i, 0)),   # x row tile (pipelined)
                pl.BlockSpec((1, d), lambda i: (0, 0)),    # alpha (VMEM-resident)
                pl.BlockSpec((1, d), lambda i: (0, 0)),    # beta  (VMEM-resident)
            ],
            out_specs=pl.BlockSpec((tm, d), lambda i: (i, 0)),
        ),
        compiler_params=pltpu.CompilerParams(
            dimension_semantics=("parallel",),   # v7x shards rows across its 2 TCs
            vmem_limit_bytes=vmem_limit,         # unlock the large-tile regime (v5e!)
        ),
        cost_estimate=cost,
    )(x, alpha, beta)


def ln_v4_ref(x, alpha, beta, epsilon=1e-5):
    mean = jnp.mean(x, axis=-1, keepdims=True)
    var = jnp.mean((x - mean) ** 2, axis=-1, keepdims=True)
    std = jnp.sqrt(var + epsilon)
    return (x - mean) / std * alpha + beta


if __name__ == "__main__":
    key = jax.random.PRNGKey(0)

    # Small shape matching the PyTorch module usage: seq=8, hidden=32.
    N, D = 8, 32
    x = jax.random.normal(key, (N, D), dtype=jnp.float32)
    alpha = jnp.ones((1, D), dtype=jnp.float32)   # nn.Parameter(torch.ones([1, dim]))
    beta = jnp.zeros((1, D), dtype=jnp.float32)   # nn.Parameter(torch.zeros([1, dim]))

    y = jax.block_until_ready(ln_v4(x, alpha, beta))
    y_ref = ln_v4_ref(x, alpha, beta)
    assert jnp.allclose(y, y_ref, atol=1e-5, rtol=1e-5), "mismatch (small)"

    # Ragged multi-step grid (N % tm != 0): exercises the cdiv grid with a
    # partial last block — no wrapper pad / slice.
    N2, D2 = 300, 256
    x2 = jax.random.normal(jax.random.PRNGKey(0), (N2, D2), dtype=jnp.float32)
    a2 = jnp.ones((1, D2), jnp.float32)
    b2 = jnp.zeros((1, D2), jnp.float32)
    y2 = jax.block_until_ready(ln_v4(x2, a2, b2, tm=128))
    assert jnp.allclose(y2, ln_v4_ref(x2, a2, b2), atol=1e-4, rtol=1e-4), "mismatch (ragged)"

    # Larger 128-aligned D with auto tile sizing (lane-dense store path).
    N3, D3 = 1024, 512
    x3 = jax.random.normal(jax.random.PRNGKey(0), (N3, D3), dtype=jnp.float32)
    a3 = jnp.ones((1, D3), jnp.float32)
    b3 = jnp.zeros((1, D3), jnp.float32)
    y3 = jax.block_until_ready(ln_v4(x3, a3, b3))
    assert jnp.allclose(y3, ln_v4_ref(x3, a3, b3), atol=1e-4, rtol=1e-4), "mismatch (large)"

    print("KERNEL_OK")
</pallas_src>

<mosaic_0001>
module attributes {stable_mosaic.version = 11 : i64} {
  func.func @_ln_kernel(%arg0: i32, %arg1: memref<8x32xf32, #tpu.memory_space<vmem>>, %arg2: memref<1x32xf32, #tpu.memory_space<vmem>>, %arg3: memref<1x32xf32, #tpu.memory_space<vmem>>, %arg4: memref<8x32xf32, #tpu.memory_space<vmem>>) attributes {dimension_semantics = [#tpu.dimension_semantics<parallel>], iteration_bounds = array<i64: 1>, scalar_prefetch = 0 : i64, scratch_operands = 0 : i64, tpu.core_type = #tpu.core_type<tc>, window_params = [{transform_indices = @transform_0, window_bounds = array<i64: 8, 32>}, {pipeline_mode = #tpu.pipeline_mode<synchronous>, transform_indices = @transform_1, window_bounds = array<i64: 1, 32>}, {pipeline_mode = #tpu.pipeline_mode<synchronous>, transform_indices = @transform_2, window_bounds = array<i64: 1, 32>}, {transform_indices = @transform_3, window_bounds = array<i64: 8, 32>}]} {
    %c0 = arith.constant 0 : index
    %c0_0 = arith.constant 0 : index
    %0 = vector.load %arg1[%c0, %c0_0] : memref<8x32xf32, #tpu.memory_space<vmem>>, vector<8x32xf32>
    %cst = arith.constant dense<0.000000e+00> : vector<8xf32>
    %1 = vector.multi_reduction <add>, %0, %cst [1] : vector<8x32xf32> to vector<8xf32>
    %2 = vector.shape_cast %1 : vector<8xf32> to vector<8x1xf32>
    %cst_1 = arith.constant 3.125000e-02 : f32
    %3 = vector.broadcast %cst_1 : f32 to vector<8x1xf32>
    %4 = arith.mulf %2, %3 : vector<8x1xf32>
    %5 = vector.broadcast %4 : vector<8x1xf32> to vector<8x32xf32>
    %6 = arith.subf %0, %5 : vector<8x32xf32>
    %7 = arith.mulf %6, %6 : vector<8x32xf32>
    %cst_2 = arith.constant dense<0.000000e+00> : vector<8xf32>
    %8 = vector.multi_reduction <add>, %7, %cst_2 [1] : vector<8x32xf32> to vector<8xf32>
    %9 = vector.shape_cast %8 : vector<8xf32> to vector<8x1xf32>
    %cst_3 = arith.constant 3.125000e-02 : f32
    %10 = vector.broadcast %cst_3 : f32 to vector<8x1xf32>
    %11 = arith.mulf %9, %10 : vector<8x1xf32>
    %cst_4 = arith.constant 9.99999974E-6 : f32
    %12 = vector.broadcast %cst_4 : f32 to vector<8x1xf32>
    %13 = arith.addf %11, %12 : vector<8x1xf32>
    %14 = math.rsqrt %13 : vector<8x1xf32>
    %c0_5 = arith.constant 0 : index
    %c0_6 = arith.constant 0 : index
    %15 = vector.load %arg2[%c0_5, %c0_6] : memref<1x32xf32, #tpu.memory_space<vmem>>, vector<1x32xf32>
    %c0_7 = arith.constant 0 : index
    %c0_8 = arith.constant 0 : index
    %16 = vector.load %arg3[%c0_7, %c0_8] : memref<1x32xf32, #tpu.memory_space<vmem>>, vector<1x32xf32>
    %17 = vector.broadcast %14 : vector<8x1xf32> to vector<8x32xf32>
    %18 = arith.mulf %6, %17 : vector<8x32xf32>
    %19 = vector.broadcast %15 : vector<1x32xf32> to vector<8x32xf32>
    %20 = arith.mulf %18, %19 : vector<8x32xf32>
    %21 = vector.broadcast %16 : vector<1x32xf32> to vector<8x32xf32>
    %22 = arith.addf %20, %21 : vector<8x32xf32>
    %c0_9 = arith.constant 0 : index
    %c0_10 = arith.constant 0 : index
    %23 = vector.load %arg4[%c0_9, %c0_10] : memref<8x32xf32, #tpu.memory_space<vmem>>, vector<8x32xf32>
    tpu.vector_store %arg4[%c0_9, %c0_10], %22 {strides = array<i32>} : memref<8x32xf32, #tpu.memory_space<vmem>>, vector<8x32xf32>,
    return
  }
  func.func @transform_0(%arg0: i32) -> (i32, i32) {
    %c0_i32 = arith.constant 0 : i32
    %c0_i32_0 = arith.constant 0 : i32
    return %arg0, %c0_i32 : i32, i32
  }
  func.func @transform_1(%arg0: i32) -> (i32, i32) {
    %c0_i32 = arith.constant 0 : i32
    %c0_i32_0 = arith.constant 0 : i32
    %c0_i32_1 = arith.constant 0 : i32
    return %c0_i32, %c0_i32_0 : i32, i32
  }
  func.func @transform_2(%arg0: i32) -> (i32, i32) {
    %c0_i32 = arith.constant 0 : i32
    %c0_i32_0 = arith.constant 0 : i32
    %c0_i32_1 = arith.constant 0 : i32
    return %c0_i32, %c0_i32_0 : i32, i32
  }
  func.func @transform_3(%arg0: i32) -> (i32, i32) {
    %c0_i32 = arith.constant 0 : i32
    %c0_i32_0 = arith.constant 0 : i32
    return %arg0, %c0_i32 : i32, i32
  }
}

</mosaic_0001>

<bundles_post_ra>
// kernel: tpu_custom_call.1
= control target key start
LH: loop header
LB: loop body
LE: loop exit
PB: predicated region body
PF: predicated region fallthrough
CT: control target
= control target key end

     0   :  { %8 = vsyncpa [#allocation3], 0  ;;  %s161_s0 = inlined_call_operand.hbm [shape: f32[8,32], index: 0, kind: input, shape index: {}]   ;;  %s162_s1 = inlined_call_operand.vmem [shape: f32[1,32], index: 1, kind: input, shape index: {}]   ;;  %s163_s2 = inlined_call_operand.vmem [shape: f32[1,32], index: 2, kind: input, shape index: {}]   ;;  %s164_s3 = inlined_call_operand.hbm [shape: f32[8,32], index: 3, kind: output, shape index: {}]  }
   0x1   :  { %9 = vsyncpa [#allocation4], 0  ;;  %s124_s12 = smov [#allocation2]  }
   0x2   :  { %s16_s13 = sshll.u32 %s124_s12, 4  ;;  %s17_s13 = int_to_ptr.vmem [resolvable:$true] %s16_s13 }
   0x3   :  { %s88_s14 = scalar_lea.vmem %s17_s13, 128  ;;  %p93_p1 = scmp.lt.s32.totalorder %s17_s13, %s17_s13 }
   0x4   :  { %p89_p0 = scmp.ne.s32.totalorder %s17_s13, %s88_s14  ;;  %p94_p2 = scmp.lt.s32.totalorder %s88_s14, %s88_s14 }
   0x6   :  { %p95_p3 = por %p94_p2, %p93_p1 }
   0x8   :  { %p96_p4 = pnand %p95_p3, %p89_p0 }
   0xa   :  { %99 = shalt.err (!%p96_p4)
}
   0xb   :  { %19 = dma.hbm_to_vmem [thread:$0]  %s161_s0, 128, %s17_s13, [#allocation3]  }
   0xc   :  { %120 = dma.done.wait [#allocation3], 128  }
   0xd   :  { %121 = vsyncadd [#allocation3], 4294967168  ;;  %vm28_vm0 = vcmask 261120   ;;  %v27_v0 = vld [vmem:[#allocation2] sm:$0xff]  ;;  %s125_s20 = smov [#allocation5]  }
   0xe   :  { %v29_v1 = vsel %vm28_vm0, %v27_v0, 0.0  ;;  %v74_v11 = vld [vmem:[%s162_s1] ss:$0 sm:$0xff]  ;;  %s65_s21 = sshll.u32 %s125_s20, 4  ;;  %s66_s21 = int_to_ptr.vmem [resolvable:$true] %s65_s21 }
   0xf   :  { %30 = vadd.xlane.f32.xlu0 %v29_v1  ;;  %v75_v13 = vld [vmem:[%s163_s2] ss:$0 sm:$0xff]  ;;  %s100_s22 = scalar_lea.vmem %s66_s21, 128  ;;  %p105_p6 = scmp.lt.s32.totalorder %s66_s21, %s66_s21 }
  0x10   :  { %p101_p5 = scmp.ne.s32.totalorder %s66_s21, %s100_s22  ;;  %p106_p7 = scmp.lt.s32.totalorder %s100_s22, %s100_s22 }
  0x12   :  { %p107_p8 = por %p106_p7, %p105_p6 }
  0x14   :  { %p108_p9 = pnand %p107_p8, %p101_p5 }
  0x98   :  { %v31_v2 = vpop.xlane.xlu0 %30 }
  0x99   :  { %v32_v3 = vmul.f32 0.03125, %v31_v2 }
  0x9b   :  { %v33_v4 = vsub.f32 %v27_v0, %v32_v3 }
  0x9d   :  { %v34_v5 = vmul.f32 %v33_v4, %v33_v4 }
  0x9f   :  { %v35_v6 = vsel %vm28_vm0, %v34_v5, 0.0 }
  0xa0   :  { %36 = vadd.xlane.f32.xlu0 %v35_v6 }
 0x129   :  { %v37_v7 = vpop.xlane.xlu0 %36 }
 0x12a   :  { %v38_v8 = vmul.f32 0.03125, %v37_v7 }
 0x12c   :  { %v39_v9 = vadd.f32 1e-05, %v38_v8 }
 0x12e   :  { %78 = vrsqrt.f32 %v39_v9 }
 0x13b   :  { %v79_v10 = vpop.eup %78 }
 0x13c   :  { %v43_v12 = vmul.f32 %v79_v10, %v33_v4 }
 0x13e   :  { %v50_v14 = vmul.f32 %v74_v11, %v43_v12 }
 0x140   :  { %v57_v15 = vadd.f32 %v75_v13, %v50_v14 }
 0x142   :  { %58 = vst.msk [vmem:[#allocation5] sm:$0xff] %vm28_vm0, %v57_v15 }
 0x143   :  { %111 = shalt.err (!%p108_p9)
}
 0x144   :  { %68 = dma.vmem_to_hbm [thread:$0]  %s66_s21, 128, %s164_s3, [#allocation4]  }
 0x145   :  { %122 = dma.done.wait [#allocation4], 128  }
 0x146   :  { %123 = vsyncadd [#allocation4], 4294967168 }
 0x147   :  { %72 = vsyncpa [#allocation3], 1 }
 0x148   :  { %73 = vsyncpa [#allocation4], 1 }

</bundles_post_ra>
